<compile_context>
chip_gen: v5e
topology: v5e:2x2
jax: 0.10.0
libtpu: 0.0.40
codegen_flags: <defaults>
</compile_context>

<pallas_src>
import numpy as np
import jax
import jax.numpy as jnp
from jax.experimental import pallas as pl
from jax.experimental.pallas import tpu as pltpu

_LANE = 128
_SUBLANE = 8
_MiB = 1024 * 1024


def _round_up(x, m):
    return ((x + m - 1) // m) * m


def _vmem_capacity_bytes():
    """Physical VMEM of the attached TPU; conservative fallback if unknown."""
    try:
        info = pltpu.get_tpu_info()
        cap = int(getattr(info, "vmem_capacity_bytes", 0))
        if cap > 0:
            return cap
    except Exception:
        pass
    return 64 * _MiB          # safe for every generation (v7x physical size)


def _mesh_unpool_kernel(f_ref, g_ref, occ_ref, o_ref, acc_ref):
    # f_ref   : (1, NFp, KE)  features tile (compute dtype, e.g. bf16)
    # g_ref   : (1, KE,  TT)  group-matrix tile (int8 / bf16 / f32)
    # occ_ref : (1, 1,   TT)  occurrences tile (f32, pad value 1)
    # o_ref   : (1, NFp, TT)  output tile
    # acc_ref : (NFp, TT)     f32 accumulator, resident across the k axis
    k = pl.program_id(2)

    @pl.when(k == 0)
    def _init():
        acc_ref[...] = jnp.zeros_like(acc_ref)

    f = f_ref[0]
    g = g_ref[0]
    if g.dtype != f.dtype:
        # int8 -> bf16 dequant; exact because group entries are strictly 0/1.
        g = g.astype(f.dtype)
    acc_ref[...] += jnp.dot(f, g, preferred_element_type=jnp.float32)

    @pl.when(k == pl.num_programs(2) - 1)
    def _finalize():
        # occ is constant over the E reduction, so scaling the small (NFp, TT)
        # accumulator equals dividing the (E, T) unroll matrix beforehand.
        inv_occ = pl.reciprocal(occ_ref[0], approx=False)        # (1, TT)
        o_ref[0] = (acc_ref[...] * inv_occ).astype(o_ref.dtype)


def mesh_unpool(features, unroll_mat, occurrences, *,
                compute_dtype=jnp.bfloat16, out_dtype=None,
                max_tile_t=4096, vmem_budget_bytes=None):
    """features: (B, NF, E); unroll_mat (groups): (B, E, T); occurrences: (B, 1, T).

    Returns (B, NF, T) = features @ (unroll_mat / occurrences), per batch.

    unroll_mat may be int8 / bf16 / f32; it is cast to `compute_dtype` inside
    the kernel (exact for 0/1 selection matrices).  Use compute_dtype=f32 if
    the unroll matrix carries non-binary weights that need full precision.
    """
    B, NF, E = features.shape
    Bg, Eg, T = unroll_mat.shape
    assert Bg == B and Eg == E, "unroll_mat must be (B, E, T)"
    out_dtype = features.dtype if out_dtype is None else out_dtype

    capacity = _vmem_capacity_bytes()
    budget = int(capacity * 0.70) if vmem_budget_bytes is None else int(vmem_budget_bytes)

    f_bytes = jnp.dtype(compute_dtype).itemsize
    g_bytes = jnp.dtype(unroll_mat.dtype).itemsize
    o_bytes = jnp.dtype(out_dtype).itemsize

    # Layout-friendly padded sizes: NFp multiple of 16 (bf16 sublane packing),
    # Ep multiple of 32 (int8 sublane packing), T padded to whole lane tiles.
    NFp = _round_up(NF, 16)
    Ep = _round_up(E, 32)
    Tp = _round_up(T, _LANE)

    def vmem_estimate(ke, tt):
        feat = 2 * NFp * ke * f_bytes           # double-buffered features tile
        grp = 2 * ke * tt * g_bytes             # streamed group-matrix tile
        occ = 2 * _SUBLANE * tt * 4             # occurrences tile (sublane padded)
        out = 2 * NFp * tt * o_bytes            # output tile
        acc = NFp * tt * 4                      # f32 accumulator scratch
        tmp = ke * tt * f_bytes + NFp * tt * 4  # in-kernel cast + matmul temporaries
        return feat + grp + occ + out + acc + tmp

    def best_tt(ke):
        tt = max(_LANE, min(Tp, _round_up(max_tile_t, _LANE)))
        while tt > _LANE and vmem_estimate(ke, tt) > budget:
            tt -= _LANE
        return tt

    # 1) Prefer the full E extent per step (no reduction tiling).
    KE = Ep
    TT = best_tt(KE)
    # 2) If even a 128-wide T tile does not fit, tile the E (reduction) axis.
    while vmem_estimate(KE, TT) > budget:
        half = max(_LANE, ((KE // 2) // _LANE) * _LANE)
        if half >= KE:
            break
        KE = half
        TT = best_tt(KE)
    if vmem_estimate(KE, TT) > budget:
        raise ValueError(
            "MeshUnpool tiles do not fit the VMEM budget "
            f"({vmem_estimate(KE, TT)} > {budget} bytes) for NF={NF}, E={E}, T={T}; "
            "the feature/output tiles alone exceed this chip's VMEM.")
    if KE != Ep:
        Ep = _round_up(E, KE)                   # whole reduction tiles only

    # Keep >= 2 parallel grid steps so both TensorCores of a 2-TC chip get work.
    if B == 1 and Tp >= 2 * _LANE and TT > Tp // 2:
        TT = max(_LANE, ((Tp // 2) // _LANE) * _LANE)

    Tpad = _round_up(T, TT)
    n_t = Tpad // TT
    n_k = Ep // KE

    # Host-side padding: groups/features pad with 0, occurrences pad with 1,
    # so padded rows/cols contribute exactly nothing and padded lanes read 0.
    features_p = jnp.pad(features.astype(compute_dtype),
                         ((0, 0), (0, NFp - NF), (0, Ep - E)))
    groups_p = jnp.pad(unroll_mat, ((0, 0), (0, Ep - E), (0, Tpad - T)))
    occ_p = jnp.pad(occurrences.astype(jnp.float32),
                    ((0, 0), (0, 0), (0, Tpad - T)), constant_values=1.0)

    est = vmem_estimate(KE, TT)
    vmem_limit = int(max(est * 3 // 2, 32 * _MiB))
    vmem_limit = int(min(vmem_limit, capacity - 8 * _MiB))
    vmem_limit = int(max(vmem_limit, est + 2 * _MiB))

    out_p = pl.pallas_call(
        _mesh_unpool_kernel,
        out_shape=jax.ShapeDtypeStruct((B, NFp, Tpad), out_dtype),
        grid_spec=pltpu.PrefetchScalarGridSpec(
            num_scalar_prefetch=0,
            grid=(B, n_t, n_k),
            in_specs=[
                pl.BlockSpec((1, NFp, KE), lambda b, j, k: (b, 0, k)),  # features
                pl.BlockSpec((1, KE, TT), lambda b, j, k: (b, k, j)),   # groups (streamed)
                pl.BlockSpec((1, 1, TT), lambda b, j, k: (b, 0, j)),    # occurrences
            ],
            out_specs=pl.BlockSpec((1, NFp, TT), lambda b, j, k: (b, 0, j)),
            scratch_shapes=[pltpu.VMEM((NFp, TT), jnp.float32)],
        ),
        compiler_params=pltpu.CompilerParams(
            dimension_semantics=("parallel", "parallel", "arbitrary"),
            vmem_limit_bytes=vmem_limit,
        ),
    )(features_p, groups_p, occ_p)

    return out_p[:, :NF, :T]


# ----------------------------------------------------------------------------
# Host glue: build padded group matrices / occurrences the way MeshUnpool does.
# ----------------------------------------------------------------------------
def pad_groups(group, unroll_start, unroll_target):
    start, end = group.shape
    out = np.zeros((unroll_start, unroll_target), dtype=np.float32)
    out[:start, :end] = group
    return out


def pad_occurrences(occ, unroll_target):
    out = np.ones((unroll_target,), dtype=np.float32)   # pad value must stay 1
    out[: occ.shape[0]] = occ
    return out


# TODO(synk): mesh.unroll_gemm() mutates Python-side mesh bookkeeping only; it
# has no effect on the numerical output and has no device-side equivalent.


if __name__ == "__main__":
    # Small synthetic shapes consistent with the module's forward.
    B, NF, E, T = 2, 4, 16, 32          # batch, feature channels, edges, unroll_target

    key = jax.random.PRNGKey(0)
    kf, kg, ko = jax.random.split(key, 3)

    features = jax.random.normal(kf, (B, NF, E), dtype=jnp.float32)

    # Simulate per-mesh get_groups(): binary selection matrices of varying
    # (unpadded) sizes, and get_occurrences(): positive integer counts.
    groups_list, occ_list = [], []
    for b in range(B):
        kg, k1 = jax.random.split(kg)
        ko, k2 = jax.random.split(ko)
        start, end = E - 2 * b, T - 4 * b          # slightly different sizes per mesh
        g = (jax.random.uniform(k1, (start, end)) < 0.3).astype(jnp.float32)
        occ = jax.random.randint(k2, (end,), 1, 4).astype(jnp.float32)
        groups_list.append(pad_groups(np.asarray(g), E, T))
        occ_list.append(pad_occurrences(np.asarray(occ), T))

    unroll_mat_f32 = jnp.asarray(np.stack(groups_list, axis=0))          # (B, E, T)
    occurrences = jnp.asarray(np.stack(occ_list, axis=0))[:, None, :]    # (B, 1, T)

    # Group entries are exactly 0/1, so streaming them as int8 is lossless and
    # quarters the HBM traffic of the dominant (E, T) stream vs f32.
    unroll_mat_i8 = unroll_mat_f32.astype(jnp.int8)

    out = mesh_unpool(features, unroll_mat_i8, occurrences)
    out = jax.block_until_ready(out)

    # Reference (mirrors torch.matmul(features, unroll_mat / occ)).  The kernel's
    # MXU path computes with bf16 features, so the reference pre-rounds features
    # to bf16; the remaining difference is f32 accumulation order + 1/occ rounding.
    feats_bf16 = np.asarray(features.astype(jnp.bfloat16).astype(jnp.float32),
                            dtype=np.float64)
    ref = np.matmul(feats_bf16,
                    np.asarray(unroll_mat_f32 / occurrences, dtype=np.float64))
    np.testing.assert_allclose(np.asarray(out, dtype=np.float64), ref,
                               rtol=1e-4, atol=1e-4)

    print("KERNEL_OK")
</pallas_src>

<mosaic_0001>
module attributes {stable_mosaic.version = 11 : i64} {
  func.func @_mesh_unpool_kernel(%arg0: i32, %arg1: i32, %arg2: i32, %arg3: memref<1x16x32xbf16, #tpu.memory_space<vmem>>, %arg4: memref<1x32x128xi8, #tpu.memory_space<vmem>>, %arg5: memref<1x1x128xf32, #tpu.memory_space<vmem>>, %arg6: memref<1x16x128xf32, #tpu.memory_space<vmem>>, %arg7: memref<16x128xf32, #tpu.memory_space<vmem>>) attributes {dimension_semantics = [#tpu.dimension_semantics<parallel>, #tpu.dimension_semantics<parallel>, #tpu.dimension_semantics<arbitrary>], iteration_bounds = array<i64: 2, 1, 1>, scalar_prefetch = 0 : i64, scratch_operands = 1 : i64, tpu.core_type = #tpu.core_type<tc>, window_params = [{transform_indices = @transform_0, window_bounds = array<i64: 1, 16, 32>}, {transform_indices = @transform_1, window_bounds = array<i64: 1, 32, 128>}, {transform_indices = @transform_2, window_bounds = array<i64: 1, 1, 128>}, {transform_indices = @transform_3, window_bounds = array<i64: 1, 16, 128>}]} {
    %c0_i32 = arith.constant 0 : i32
    %0 = arith.cmpi eq, %arg2, %c0_i32 : i32
    %1 = arith.extui %0 : i1 to i32
    %c0_i32_0 = arith.constant 0 : i32
    %2 = arith.cmpi ne, %1, %c0_i32_0 : i32
    scf.if %2 {
      %cst_12 = arith.constant 0.000000e+00 : f32
      %15 = vector.broadcast %cst_12 : f32 to vector<16x128xf32>
      %c0_13 = arith.constant 0 : index
      %c0_14 = arith.constant 0 : index
      %16 = vector.load %arg7[%c0_13, %c0_14] : memref<16x128xf32, #tpu.memory_space<vmem>>, vector<16x128xf32>
      tpu.vector_store %arg7[%c0_13, %c0_14], %15 {strides = array<i32>} : memref<16x128xf32, #tpu.memory_space<vmem>>, vector<16x128xf32>,
    } else {
    }
    %c0 = arith.constant 0 : index
    %c0_1 = arith.constant 0 : index
    %c0_2 = arith.constant 0 : index
    %3 = vector.load %arg3[%c0, %c0_1, %c0_2] : memref<1x16x32xbf16, #tpu.memory_space<vmem>>, vector<1x16x32xbf16>
    %4 = vector.shape_cast %3 : vector<1x16x32xbf16> to vector<16x32xbf16>
    %c0_3 = arith.constant 0 : index
    %c0_4 = arith.constant 0 : index
    %c0_5 = arith.constant 0 : index
    %5 = vector.load %arg4[%c0_3, %c0_4, %c0_5] : memref<1x32x128xi8, #tpu.memory_space<vmem>>, vector<1x32x128xi8>
    %6 = vector.shape_cast %5 : vector<1x32x128xi8> to vector<32x128xi8>
    %7 = arith.sitofp %6 : vector<32x128xi8> to vector<32x128xbf16>
    %c0_6 = arith.constant 0 : index
    %c0_7 = arith.constant 0 : index
    %8 = vector.load %arg7[%c0_6, %c0_7] : memref<16x128xf32, #tpu.memory_space<vmem>>, vector<16x128xf32>
    %cst = arith.constant dense<0.000000e+00> : vector<16x128xf32>
    %9 = tpu.matmul %4, %7, %cst {dimension_numbers = #tpu.dot_dimension_numbers<[1], [0], [0], [1], [0, 0, 1, 1], [], []>} : vector<16x32xbf16>, vector<32x128xbf16>, vector<16x128xf32> -> vector<16x128xf32>
    %10 = arith.addf %8, %9 : vector<16x128xf32>
    %c0_8 = arith.constant 0 : index
    %c0_9 = arith.constant 0 : index
    %11 = vector.load %arg7[%c0_8, %c0_9] : memref<16x128xf32, #tpu.memory_space<vmem>>, vector<16x128xf32>
    tpu.vector_store %arg7[%c0_8, %c0_9], %10 {strides = array<i32>} : memref<16x128xf32, #tpu.memory_space<vmem>>, vector<16x128xf32>,
    %c0_i32_10 = arith.constant 0 : i32
    %12 = arith.cmpi eq, %arg2, %c0_i32_10 : i32
    %13 = arith.extui %12 : i1 to i32
    %c0_i32_11 = arith.constant 0 : i32
    %14 = arith.cmpi ne, %13, %c0_i32_11 : i32
    scf.if %14 {
      %c0_12 = arith.constant 0 : index
      %c0_13 = arith.constant 0 : index
      %c0_14 = arith.constant 0 : index
      %15 = vector.load %arg5[%c0_12, %c0_13, %c0_14] : memref<1x1x128xf32, #tpu.memory_space<vmem>>, vector<1x1x128xf32>
      %16 = vector.shape_cast %15 : vector<1x1x128xf32> to vector<1x128xf32>
      %17 = tpu.reciprocal %16 : vector<1x128xf32> -> vector<1x128xf32>
      %c0_15 = arith.constant 0 : index
      %c0_16 = arith.constant 0 : index
      %18 = vector.load %arg7[%c0_15, %c0_16] : memref<16x128xf32, #tpu.memory_space<vmem>>, vector<16x128xf32>
      %19 = vector.broadcast %17 : vector<1x128xf32> to vector<16x128xf32>
      %20 = arith.mulf %18, %19 : vector<16x128xf32>
      %c0_17 = arith.constant 0 : index
      %c0_18 = arith.constant 0 : index
      %c0_19 = arith.constant 0 : index
      %21 = vector.load %arg6[%c0_17, %c0_18, %c0_19] : memref<1x16x128xf32, #tpu.memory_space<vmem>>, vector<1x16x128xf32>
      %22 = vector.shape_cast %21 : vector<1x16x128xf32> to vector<16x128xf32>
      %23 = vector.shape_cast %20 : vector<16x128xf32> to vector<1x16x128xf32>
      tpu.vector_store %arg6[%c0_17, %c0_18, %c0_19], %23 {strides = array<i32>} : memref<1x16x128xf32, #tpu.memory_space<vmem>>, vector<1x16x128xf32>,
    } else {
    }
    return
  }
  func.func @transform_0(%arg0: i32, %arg1: i32, %arg2: i32) -> (i32, i32, i32) {
    %c0_i32 = arith.constant 0 : i32
    %c0_i32_0 = arith.constant 0 : i32
    return %arg0, %c0_i32, %arg2 : i32, i32, i32
  }
  func.func @transform_1(%arg0: i32, %arg1: i32, %arg2: i32) -> (i32, i32, i32) {
    %c0_i32 = arith.constant 0 : i32
    return %arg0, %arg2, %arg1 : i32, i32, i32
  }
  func.func @transform_2(%arg0: i32, %arg1: i32, %arg2: i32) -> (i32, i32, i32) {
    %c0_i32 = arith.constant 0 : i32
    %c0_i32_0 = arith.constant 0 : i32
    return %arg0, %c0_i32, %arg1 : i32, i32, i32
  }
  func.func @transform_3(%arg0: i32, %arg1: i32, %arg2: i32) -> (i32, i32, i32) {
    %c0_i32 = arith.constant 0 : i32
    %c0_i32_0 = arith.constant 0 : i32
    return %arg0, %c0_i32, %arg1 : i32, i32, i32
  }
}

</mosaic_0001>

<bundles_post_ra>
// kernel: tpu_custom_call.1
= control target key start
LH: loop header
LB: loop body
LE: loop exit
PB: predicated region body
PF: predicated region fallthrough
CT: control target
= control target key end

     0   :  { %s978_s0 = inlined_call_operand.hbm [shape: bf16[2,16,32], index: 0, kind: input, shape index: {}]   ;;  %s979_s1 = inlined_call_operand.hbm [shape: s8[2,32,128], index: 1, kind: input, shape index: {}]   ;;  %s980_s2 = inlined_call_operand.hbm [shape: f32[2,1,128], index: 2, kind: input, shape index: {}]   ;;  %s981_s3 = inlined_call_operand.hbm [shape: f32[2,16,128], index: 3, kind: output, shape index: {}]  }
   0x1   :  { %983 = sst [smem:[#allocation14_spill]] %s978_s0 }
   0x2   :  { %8 = vsyncpa [#allocation4], 0 }
   0x3   :  { %10 = vsyncpa [#allocation4 + $0x1], 0 }
   0x4   :  { %11 = vsyncpa [#allocation7], 0 }
   0x5   :  { %13 = vsyncpa [#allocation7 + $0x1], 0 }
   0x6   :  { %14 = vsyncpa [#allocation5], 0 }
   0x7   :  { %16 = vsyncpa [#allocation5 + $0x1], 0  ;;  %s824_s12 = smov 0   ;;  %s826_s13 = smov 0  }
   0x8   :  { %s828_s14 = smov 0   ;;  %s830_s15 = smov 0  }
   0x9   :  { %s832_s16 = smov 0   ;;  %s834_s17 = smov 0  }
   0xa LB: > { %s855_s18 = sadd.s32 4294967295, %s798_s17   ;;  %s519_s19 = sadd.s32 4294967294, %s798_s17   ;;  %s798_s17 = sphi %s834_s17, %s22_s17   ;;  %s794_s16 = sphi %s832_s16, %s996_s16   ;;  %s790_s15 = sphi %s830_s15, %s995_s15   ;;  %s786_s14 = sphi %s828_s14, %s994_s14   ;;  %s782_s13 = sphi %s826_s13, %s993_s13   ;;  %s778_s12 = sphi %s824_s12, %s992_s12  }
   0xb   : > { %s41_s20 = sadd.s32 1, %s794_s16  ;;  %s50_s21 = sadd.s32 1, %s786_s14 }
   0xc   : > { %p43_p0 = scmp.ge.s32.totalorder %s41_s20, 2  ;;  %p57_p1 = scmp.ne.s32.totalorder %s786_s14, %s782_s13 }
   0xd   : > { %p58_p2 = scmp.eq.s32.totalorder %s798_s17, 0  ;;  %p63_p3 = scmp.ne.s32.totalorder %s782_s13, %s778_s12 }
   0xe   : > { %s998_s20 = smov (%p43_p0, %s41_s20), 0  ;;  %p64_p5 = scmp.eq.s32.totalorder %s855_s18, 0 }
   0xf   : > { %984 = sst [smem:[#allocation13_spill]] %s998_s20  ;;  %p867_p4 = por %p58_p2, %p57_p1 }
  0x10   : > { %s45_s23 = ssub.s32 %s794_s16, %s998_s20  ;;  %p147_p6 = scmp.eq.s32.totalorder %s855_s18, 1 }
  0x11   : > { %p48_p7 = scmp.eq.s32.totalorder %s45_s23, 0  ;;  %p875_p8 = por %p64_p5, %p63_p3 }
  0x12   : > { %p879_p9 = por %p147_p6, %p57_p1  ;;  %p153_p10 = scmp.eq.s32.totalorder %s519_s19, 1 }
  0x13   : > { %s884_s26 = scalar_select %p48_p7, %s786_s14, %s50_s21  }
  0x14   : > { %p886_p11 = por %p153_p10, %p63_p3  ;;  %p521_p12 = scmp.ge.s32.totalorder %s798_s17, 2 }
  0x15   : > { %p566_p13 = scmp.lt.s32.totalorder %s798_s17, 2  ;;  %s893_s28 = sand.u32 1, %s786_s14  }
  0x16   : > { %s522_s29 = sshll.u32 %s893_s28, 3  ;;  %s541_s30 = sshll.u32 %s794_s16, 3 }
  0x17   : > { %s989_s0 = sld [smem:[#allocation14_spill]]  ;;  %s177_s8 = scalar_lea.vmem [#allocation3], %s522_s29 }
  0x18   : > { %s186_s9 = sshll.u32 %s177_s8, 4  ;;  %p902_p0 = pnand %p566_p13, %p867_p4  ;;  %s187_s9 = int_to_ptr.vmem [resolvable:$true] %s186_s9 }
  0x19   : > { %s196_s11 = sand.u32 1, %s798_s17   ;;  %s206_s23 = scalar_lea.hbm %s979_s1, %s541_s30 }
  0x1a   : > { %s208_s4 = sshll.u32 %s206_s23, 4  ;;  %s200_s5 = scalar_lea.vmem [#allocation6], %s522_s29  ;;  %s209_s4 = int_to_ptr.hbm [resolvable:$true] %s208_s4 }
  0x1b   : > { %s197_s22 = scalar_lea.sflag [#allocation7], %s196_s11  ;;  %p527_p1 = scmp.ge.s32.totalorder %s798_s17, 1 }
  0x1c   : > { %p233_p2 = scmp.lt.s32.totalorder %s798_s17, 3  ;;  %s174_s8 = scalar_lea.sflag [#allocation4], %s893_s28 }
  0x1d   : > { %s183_s6 = scalar_lea.hbm %s989_s0, %s541_s30  ;;  %s800_s0 = smov 64  }
  0x1e   : > { %s184_s7 = sshll.u32 %s183_s6, 4  ;;  %s210_s6 = sshll.u32 %s200_s5, 4  ;;  %s185_s7 = int_to_ptr.hbm [resolvable:$true] %s184_s7  ;;  %s211_s6 = int_to_ptr.vmem [resolvable:$true] %s210_s6 }
  0x1f   : > { %558 = dma.hbm_to_vmem [thread:$0]  (!%p902_p0), %s209_s4, 128, %s211_s6, %s197_s22  }
  0x20   : > { %p234_p3 = pnand %p527_p1, %p233_p2  ;;  %s801_s20 = smov 4  }
  0x21   : > { %555 = dma.hbm_to_vmem [thread:$0]  (!%p902_p0), %s185_s7, 128, %s187_s9, %s174_s8, %s800_s0, %s800_s0, %s801_s20  }
  0x22   : > { %s224_s21 = scalar_lea.hbm %s980_s2, %s794_s16  ;;  %s220_s23 = scalar_lea.vmem [#allocation8], %s893_s28 }
  0x23   : > { %s226_s29 = sshll.u32 %s224_s21, 4  ;;  %s228_s5 = sshll.u32 %s220_s23, 4  ;;  %s227_s29 = int_to_ptr.hbm [resolvable:$true] %s226_s29  ;;  %s229_s5 = int_to_ptr.vmem [resolvable:$true] %s228_s5 }
  0x24   : > { %561 = dma.hbm_to_vmem [thread:$0]  (!%p902_p0), %s227_s29, 16, %s229_s5, %s197_s22  }
  0x25   : > { %237 = sbr.rel (%p234_p3) target bundleno = 200 (0xc8), region = 32  ;;  %s925_s11 = sand.u32 (!%p234_p3), 1, %s782_s13  }
  0x26   : > { %s528_s4 = sshll.u32 (!%p234_p3), %s925_s11, 3  ;;  %s240_s0 = scalar_lea.sflag (!%p234_p3), [#allocation4], %s925_s11 }
  0x27   : > { %s243_s20 = scalar_lea.vmem (!%p234_p3), [#allocation3], %s528_s4 }
  0x2a   : > { %765 = dma.done.wait (%p875_p8), %s240_s0, 128  }
  0x2b   : > { %767 = vsyncadd (%p875_p8), %s240_s0, 4294967168  ;;  %s249_s28 = sand.u32 1, %s855_s18   ;;  %s253_s9 = scalar_lea.vmem [#allocation6], %s528_s4 }
  0x2c   : > { %s250_s7 = scalar_lea.sflag [#allocation7], %s249_s28 }
  0x2d   : > { %769 = dma.done.wait (%p875_p8), %s250_s7, 144  }
  0x2e   : > { %771 = vsyncadd (%p875_p8), %s250_s7, 4294967152  ;;  %v304_v0 = vld [vmem:[%s253_s9] sm:$0xff]  ;;  %v542_v11 = vld [vmem:[%s243_s20] sm:$0xff]  ;;  %vm322_vm0 = vcmask 261120   ;;  %s262_s18 = scalar_lea.vmem [#allocation8], %s925_s11  ;;  %s530_s24 = sshll.u32 %s925_s11, 4 }
  0x2f   : > { %v307_v1 = vunpack.c.2.s8 %v304_v0  ;;  %v308_v2 = vunpack.c.3.s8 %v304_v0  ;;  %v305_v3 = vunpack.c.0.s8 %v304_v0  ;;  %v306_v4 = vunpack.c.1.s8 %v304_v0  ;;  %v347_v12 = vld [vmem:[%s262_s18] sm:$0x1]  ;;  %s543_s10 = sshll.u32 %s790_s15, 4  ;;  %s294_s19 = scalar_lea.vmem [#allocation9], %s530_s24 }
  0x30   : > { %620 = vrcp.f32 %v347_v12  ;;  %vm353_vm1 = vweird.f32 %v347_v12  ;;  %v359_v17 = vand.u32 2147483648, %v347_v12  ;;  %v357_v19 = vand.u32 2147483647, %v347_v12  ;;  %s384_s8 = scalar_lea.hbm %s981_s3, %s543_s10  ;;  %s385_s30 = sshll.u32 %s294_s19, 4  ;;  %s386_s30 = int_to_ptr.vmem [resolvable:$true] %s385_s30 }
  0x31   : > { %v311_v5 = vcvt.s32.f32 %v307_v1  ;;  %v312_v6 = vcvt.s32.f32 %v308_v2  ;;  %v309_v7 = vcvt.s32.f32 %v305_v3  ;;  %v310_v8 = vcvt.s32.f32 %v306_v4  ;;  %s387_s21 = sshll.u32 %s384_s8, 4  ;;  %s372_s29 = scalar_lea.sflag [#allocation5], %s925_s11  ;;  %s388_s21 = int_to_ptr.hbm [resolvable:$true] %s387_s21 }
  0x32   : > { %v360_v20 = vor.u32 1.1754944e-38, %v359_v17  ;;  %vm358_vm4 = vcmp.eq.f32.partialorder %v357_v19, 8.507059e+37  ;;  %s726_s23 = sshra.s32 %s388_s21, 4  ;;  %s732_s0 = scalar_lea.hbm %s981_s3, 32  ;;  %s727_s23 = int_to_ptr.hbm [resolvable:$true] %s726_s23 }
  0x33   : > { %v314_v9 = vpack.c.bf16 %v312_v6, %v311_v5  ;;  %v313_v10 = vpack.c.bf16 %v310_v8, %v309_v7  ;;  %s728_s15 = scalar_lea.hbm %s727_s23, 16  ;;  %p733_p7 = scmp.lt.s32.totalorder %s727_s23, %s981_s3 }
  0x34   : > { %p729_p4 = scmp.ne.s32.totalorder %s727_s23, %s728_s15  ;;  %p734_p8 = scmp.lt.s32.totalorder %s732_s0, %s728_s15 }
  0x35   : > { %332 = vmatpush.bf16.msra.mxu0 %v314_v9 }
  0x36   : > { %v621_v13 = vpop.eup %620  ;;  %p730_p5 = pnand %p729_p4, %p879_p9  ;;  %p735_p10 = por %p734_p8, %p733_p7 }
  0x37   : > { %v349_v14 = vmul.f32 %v621_v13, %v347_v12  ;;  %vm354_vm2 = vweird.f32 %v621_v13 }
  0x38   : > { %vm355_vm3 = vmor %vm353_vm1, %vm354_vm2  ;;  %p731_p6 = pneg %p730_p5 }
  0x39   : > { %333 = vmatpush.bf16.msra.mxu0 %v313_v10  ;;  %v350_v15 = vsub.f32 1.0, %v349_v14 }
  0x3a   : > { %p736_p13 = pnand %p735_p10, %p731_p6 }
  0x3b   : > { %v351_v16 = vmul.f32 %v621_v13, %v350_v15 }
  0x3c   : > { %535 = vmatmul.msk.bf16.vlgmr.msra.gmra.mxu0 %vm322_vm0, %v542_v11 }
  0x3d   : > { %v352_v18 = vadd.f32 %v621_v13, %v351_v16 }
  0x3f   : > { %v356_v21 = vsel %vm355_vm3, %v621_v13, %v352_v18 }
  0x40   : > { %v361_v22 = vsel %vm358_vm4, %v360_v20, %v356_v21 }
  0x41   : > { %v365_v23 = vperm.slane %v361_v22, 0 }
  0xb9   : > { %v335_v24 = vpop.f32.mrf.mxu0 }
  0xba   : > { %v367_v25 = vmul.f32 %v365_v23, %v335_v24 }
  0xbc   : > { %369 = vst [vmem:[%s294_s19] sm:$0xff] %v367_v25 }
  0xc1   : > { %v337_v26 = vpop.f32.mrf.mxu0 }
  0xc2   : > { %v368_v27 = vmul.f32 %v365_v23, %v337_v26 }
  0xc4   : > { %370 = vst [vmem:[%s294_s19 + $0x8] sm:$0xff] %v368_v27 }
  0xc5   : > { %739 = shalt.err (!%p736_p13)
}
  0xc6   : > { %s802_s11 = smov 128   ;;  %s803_s7 = smov 8  }
  0xc7   : > { %550 = dma.vmem_to_hbm [thread:$0]  (%p879_p9), %s386_s30, 256, %s388_s21, %s372_s29, %s802_s11, %s802_s11, %s803_s7  }
  0xc8 PF: > { %s402_s9 = sand.u32 1, %s778_s12   ;;  %p563_p0 = pnand %p521_p12, %p886_p11 }
  0xc9   : > { %s403_s18 = scalar_lea.sflag [#allocation5], %s402_s9 }
  0xca   : > { %p564_p1 = pneg %p563_p0 }
  0xcc   : > { %773 = dma.done.wait (%p564_p1), %s403_s18, 256  }
  0xcd   : > { %775 = vsyncadd (%p564_p1), %s403_s18, 4294967040  ;;  %s22_s17 = sadd.s32 1, %s798_s17   ;;  %s991_s25 = sld [smem:[#allocation13_spill]] }
  0xce   : > { %p19_p2 = scmp.ge.s32.totalorder %s22_s17, 4   ;;  %s992_s12 = smov %s782_s13 }
  0xcf   : > { %s993_s13 = smov %s786_s14  ;;  %s994_s14 = smov %s884_s26 }
  0xd0   : > { %s995_s15 = smov %s794_s16  ;;  %21 = sbr.rel (!%p19_p2) target bundleno = 10 (0xa), region = 109 }
  0xd3   : > { %s996_s16 = smov %s991_s25 }
  0xd5   :  { %409 = vsyncpa [#allocation4], 1 }
  0xd6   :  { %411 = vsyncpa [#allocation4 + $0x1], 1 }
  0xd7   :  { %412 = vsyncpa [#allocation7], 1 }
  0xd8   :  { %414 = vsyncpa [#allocation7 + $0x1], 1 }
  0xd9   :  { %415 = vsyncpa [#allocation5], 1 }
  0xda   :  { %417 = vsyncpa [#allocation5 + $0x1], 1 }

</bundles_post_ra>
